<compile_context>
chip_gen: v6e
topology: v6e:2x2x1
jax: 0.10.0
libtpu: 0.0.40
codegen_flags: <defaults>
</compile_context>

<pallas_src>
import jax
import jax.numpy as jnp
from jax import lax
from jax.experimental import pallas as pl
from jax.experimental.pallas import tpu as pltpu
import numpy as np

# ---- model hyper-params (small, consistent with the module) ----
B = 2            # batch
L = 16           # sequence length (time)
IN_CHANNELS = 4  # in_channels
NB_CLASSES = 5   # nb_classes
K1, K2, K3 = 9, 5, 3
P1, P2, P3 = K1 // 2, K2 // 2, K3 // 2
C1, C2, C3 = 128, 256, 128
HEAD_PAD = 128   # lane-dense head width (>= NB_CLASSES, multiple of 128)
EPS = 1e-5


def mtnet_kernel(a1_ref,               # (B*L, K1*Cin)     bf16 (stage-1 im2col)
                 w1_ref, t1_ref,       # (K1*Cin, C1) bf16 (BN-scale folded), (1, C1) f32
                 w2_ref, t2_ref,       # (K2*C1,  C2) bf16,                   (1, C2) f32
                 w3_ref, t3_ref,       # (K3*C2,  C3) bf16,                   (1, C3) f32
                 wc_ref, bc_ref,       # (C3, HEAD_PAD) bf16 (1/L folded),    (1, HEAD_PAD) f32
                 o_ref,                # (B, HEAD_PAD) f32
                 pad2_ref, pad3_ref):  # f32 per-sample zero-padded activations (scratch)
    Bb = pad2_ref.shape[0]
    Ll = pad2_ref.shape[1] - 2 * P2
    BL = Bb * Ll

    # -------- stage 1: Conv1d(Cin->128, k=9, p=4) + BN + ReLU : one MXU matmul --------
    h1 = jnp.dot(a1_ref[...], w1_ref[...], preferred_element_type=jnp.float32)
    h1 = jnp.maximum(h1 + t1_ref[...], 0.0)                          # (BL, C1) f32

    # -------- stage 2: Conv1d(128->256, k=5, p=2) + BN + ReLU --------
    # Zero only the halo rows (interior rows are fully overwritten just below, halo
    # extent 2*P2 is static).
    pad2_ref[:, :P2, :] = jnp.zeros((Bb, P2, C1), jnp.float32)
    pad2_ref[:, P2 + Ll:, :] = jnp.zeros((Bb, P2, C1), jnp.float32)
    pad2_ref[:, P2:P2 + Ll, :] = h1.reshape(Bb, Ll, C1)
    a2 = jnp.concatenate([pad2_ref[:, k:k + Ll, :] for k in range(K2)], axis=-1)
    a2 = a2.reshape(BL, K2 * C1).astype(jnp.bfloat16)
    h2 = jnp.dot(a2, w2_ref[...], preferred_element_type=jnp.float32)
    h2 = jnp.maximum(h2 + t2_ref[...], 0.0)                          # (BL, C2) f32

    # -------- stage 3: Conv1d(256->128, k=3, p=1) + BN + ReLU --------
    pad3_ref[:, :P3, :] = jnp.zeros((Bb, P3, C2), jnp.float32)
    pad3_ref[:, P3 + Ll:, :] = jnp.zeros((Bb, P3, C2), jnp.float32)
    pad3_ref[:, P3:P3 + Ll, :] = h2.reshape(Bb, Ll, C2)
    a3 = jnp.concatenate([pad3_ref[:, k:k + Ll, :] for k in range(K3)], axis=-1)
    a3 = a3.reshape(BL, K3 * C2).astype(jnp.bfloat16)
    h3 = jnp.dot(a3, w3_ref[...], preferred_element_type=jnp.float32)
    h3 = jnp.maximum(h3 + t3_ref[...], 0.0)                          # (BL, C3) f32

    # -------- temporal mean (1/L folded into wc) + lane-dense linear head --------
    feat = jnp.sum(h3.reshape(Bb, Ll, C3), axis=1)                   # (B, C3) f32
    out = jnp.dot(feat.astype(jnp.bfloat16), wc_ref[...],
                  preferred_element_type=jnp.float32) + bc_ref[...]  # (B, HEAD_PAD)
    o_ref[...] = out


def _im2col_stage1(x_nlc):
    """(B, L, Cin) -> (B*L, K1*Cin) shifted-window matrix (pure indexing, zero FLOPs)."""
    Bb, Ll, Cin = x_nlc.shape
    xp = jnp.pad(x_nlc, ((0, 0), (P1, P1), (0, 0)))      # per-sample zero padding
    cols = [xp[:, k:k + Ll, :] for k in range(K1)]
    return jnp.concatenate(cols, axis=-1).reshape(Bb * Ll, K1 * Cin)


def mtnet_forward(x, kparams):
    """x: (B, L, in_channels) float32 — the same tensor the PyTorch forward receives."""
    Bb, Ll, Cin = x.shape
    # PyTorch glue: .view(-1, C, L) is a memory RESHAPE (not a transpose); the kernel
    # operates channels-last, so reshape then transpose.
    x_ncl = jnp.reshape(x, (Bb, Cin, Ll))
    x_nlc = jnp.transpose(x_ncl, (0, 2, 1)).astype(jnp.float32)
    a1 = _im2col_stage1(x_nlc).astype(jnp.bfloat16)

    (w1, t1, w2, t2, w3, t3, wc, bc) = kparams

    vmem = pl.BlockSpec(memory_space=pltpu.MemorySpace.VMEM)
    out = pl.pallas_call(
        mtnet_kernel,
        out_shape=jax.ShapeDtypeStruct((Bb, HEAD_PAD), jnp.float32),
        in_specs=[vmem] * 9,
        out_specs=vmem,
        scratch_shapes=[
            pltpu.VMEM((Bb, Ll + 2 * P2, C1), jnp.float32),   # zero-padded h1
            pltpu.VMEM((Bb, Ll + 2 * P3, C2), jnp.float32),   # zero-padded h2
        ],
    )(a1, w1, t1, w2, t2, w3, t3, wc, bc)
    return out[:, :NB_CLASSES]


# ---------------- deterministic parameter construction ----------------
def make_params(key, seq_len):
    ks = jax.random.split(key, 20)
    n = lambda k, shp, s=0.1: (jax.random.normal(k, shp, jnp.float32) * s)

    # torch-layout conv weights (Cout, Cin, K) and biases
    w1t, b1 = n(ks[0], (C1, IN_CHANNELS, K1)), n(ks[1], (C1,))
    w2t, b2 = n(ks[2], (C2, C1, K2), 0.05), n(ks[3], (C2,))
    w3t, b3 = n(ks[4], (C3, C2, K3), 0.05), n(ks[5], (C3,))
    # batchnorm params (inference / running stats)
    g1, be1 = 1.0 + n(ks[6], (C1,)), n(ks[7], (C1,))
    rm1, rv1 = n(ks[8], (C1,)), 1.0 + jnp.abs(n(ks[9], (C1,)))
    g2, be2 = 1.0 + n(ks[10], (C2,)), n(ks[11], (C2,))
    rm2, rv2 = n(ks[12], (C2,)), 1.0 + jnp.abs(n(ks[13], (C2,)))
    g3, be3 = 1.0 + n(ks[14], (C3,)), n(ks[15], (C3,))
    rm3, rv3 = n(ks[16], (C3,)), 1.0 + jnp.abs(n(ks[17], (C3,)))
    # linear head (torch layout: (nc, 128))
    wct, bct = n(ks[18], (NB_CLASSES, C3)), n(ks[19], (NB_CLASSES,))

    torch_params = (w1t, b1, g1, be1, rm1, rv1,
                    w2t, b2, g2, be2, rm2, rv2,
                    w3t, b3, g3, be3, rm3, rv3,
                    wct, bct)

    # kernel-layout params:
    #  - im2col weights (K*Cin, Cout) with the BN scale folded into the columns (bf16)
    #  - conv-bias + BN folded into a single per-channel f32 shift
    def fold(bias, g, be, rm, rv):
        scale = g / jnp.sqrt(rv + EPS)
        shift = (bias - rm) * scale + be
        return scale, shift[None, :].astype(jnp.float32)

    def im2col_w(wt, scale):  # (Cout, Cin, K) -> (K*Cin, Cout), BN scale folded in f32
        Cout, Cin, K = wt.shape
        w = jnp.transpose(wt, (2, 1, 0)).reshape(K * Cin, Cout)
        return (w * scale[None, :]).astype(jnp.bfloat16)

    s1, t1 = fold(b1, g1, be1, rm1, rv1)
    s2, t2 = fold(b2, g2, be2, rm2, rv2)
    s3, t3 = fold(b3, g3, be3, rm3, rv3)
    w1 = im2col_w(w1t, s1)
    w2 = im2col_w(w2t, s2)
    w3 = im2col_w(w3t, s3)

    # lane-dense head: zero-pad to HEAD_PAD columns; fold the temporal 1/L into wc
    wc = jnp.zeros((C3, HEAD_PAD), jnp.float32).at[:, :NB_CLASSES].set(wct.T)
    wc = (wc / float(seq_len)).astype(jnp.bfloat16)
    bc = jnp.zeros((1, HEAD_PAD), jnp.float32).at[0, :NB_CLASSES].set(bct)

    kernel_params = (w1, t1, w2, t2, w3, t3, wc, bc)
    return torch_params, kernel_params


# ---------------- pure-JAX reference (mirrors PyTorch eval-mode forward, f32) ----------------
def mtnet_ref(x, torch_params):
    (w1t, b1, g1, be1, rm1, rv1,
     w2t, b2, g2, be2, rm2, rv2,
     w3t, b3, g3, be3, rm3, rv3,
     wct, bct) = torch_params

    x_ncl = jnp.reshape(x, (x.shape[0], x.shape[2], x.shape[1]))  # torch .view

    def block(h, w, b, g, be, rm, rv, pad):
        y = lax.conv_general_dilated(h, w, window_strides=(1,), padding=[(pad, pad)],
                                     dimension_numbers=('NCH', 'OIH', 'NCH'))
        y = y + b[None, :, None]
        y = (y - rm[None, :, None]) / jnp.sqrt(rv[None, :, None] + EPS) \
            * g[None, :, None] + be[None, :, None]
        return jnp.maximum(y, 0.0)

    h = block(x_ncl, w1t, b1, g1, be1, rm1, rv1, P1)
    h = block(h, w2t, b2, g2, be2, rm2, rv2, P2)
    h = block(h, w3t, b3, g3, be3, rm3, rv3, P3)
    feat = jnp.mean(h, axis=2)                 # (B, 128)
    return feat @ wct.T + bct[None, :]


if __name__ == "__main__":
    key = jax.random.PRNGKey(0)
    kx, kp = jax.random.split(key)
    # input as fed to forward(): (batch, seq_len, in_channels)
    x = jax.random.normal(kx, (B, L, IN_CHANNELS), jnp.float32)

    torch_params, kernel_params = make_params(kp, L)

    out = mtnet_forward(x, kernel_params)
    out = jax.block_until_ready(out)

    ref = mtnet_ref(x, torch_params)
    # bf16 weights/activations on the MXU path -> looser tolerance than pure-f32.
    np.testing.assert_allclose(np.asarray(out), np.asarray(ref), rtol=5e-2, atol=5e-2)

    # TODO(synk): training-mode Dropout / batch-statistics BatchNorm not implemented
    # (inference semantics used: dropout=identity, BN=running stats).
    print("KERNEL_OK")
</pallas_src>

<mosaic_0001>
module attributes {stable_mosaic.version = 11 : i64} {
  func.func @mtnet_kernel(%arg0: memref<32x36xbf16, #tpu.memory_space<vmem>>, %arg1: memref<36x128xbf16, #tpu.memory_space<vmem>>, %arg2: memref<1x128xf32, #tpu.memory_space<vmem>>, %arg3: memref<640x256xbf16, #tpu.memory_space<vmem>>, %arg4: memref<1x256xf32, #tpu.memory_space<vmem>>, %arg5: memref<768x128xbf16, #tpu.memory_space<vmem>>, %arg6: memref<1x128xf32, #tpu.memory_space<vmem>>, %arg7: memref<128x128xbf16, #tpu.memory_space<vmem>>, %arg8: memref<1x128xf32, #tpu.memory_space<vmem>>, %arg9: memref<2x128xf32, #tpu.memory_space<vmem>>, %arg10: memref<2x20x128xf32, #tpu.memory_space<vmem>>, %arg11: memref<2x18x256xf32, #tpu.memory_space<vmem>>) attributes {dimension_semantics = [], scalar_prefetch = 0 : i64, scratch_operands = 2 : i64, tpu.core_type = #tpu.core_type<tc>} {
    %c0 = arith.constant 0 : index
    %c0_0 = arith.constant 0 : index
    %0 = vector.load %arg0[%c0, %c0_0] : memref<32x36xbf16, #tpu.memory_space<vmem>>, vector<32x36xbf16>
    %c0_1 = arith.constant 0 : index
    %c0_2 = arith.constant 0 : index
    %1 = vector.load %arg1[%c0_1, %c0_2] : memref<36x128xbf16, #tpu.memory_space<vmem>>, vector<36x128xbf16>
    %cst = arith.constant dense<0.000000e+00> : vector<32x128xf32>
    %2 = tpu.matmul %0, %1, %cst {dimension_numbers = #tpu.dot_dimension_numbers<[1], [0], [0], [1], [0, 0, 1, 1], [], []>} : vector<32x36xbf16>, vector<36x128xbf16>, vector<32x128xf32> -> vector<32x128xf32>
    %c0_3 = arith.constant 0 : index
    %c0_4 = arith.constant 0 : index
    %3 = vector.load %arg2[%c0_3, %c0_4] : memref<1x128xf32, #tpu.memory_space<vmem>>, vector<1x128xf32>
    %4 = vector.broadcast %3 : vector<1x128xf32> to vector<32x128xf32>
    %5 = arith.addf %2, %4 : vector<32x128xf32>
    %cst_5 = arith.constant 0.000000e+00 : f32
    %6 = vector.broadcast %cst_5 : f32 to vector<32x128xf32>
    %7 = arith.maximumf %5, %6 : vector<32x128xf32>
    %cst_6 = arith.constant 0.000000e+00 : f32
    %8 = vector.broadcast %cst_6 : f32 to vector<2x2x128xf32>
    %c0_7 = arith.constant 0 : index
    %c0_8 = arith.constant 0 : index
    %c0_9 = arith.constant 0 : index
    %9 = vector.load %arg10[%c0_7, %c0_8, %c0_9] : memref<2x20x128xf32, #tpu.memory_space<vmem>>, vector<2x2x128xf32>
    tpu.vector_store %arg10[%c0_7, %c0_8, %c0_9], %8 {strides = array<i32>} : memref<2x20x128xf32, #tpu.memory_space<vmem>>, vector<2x2x128xf32>,
    %cst_10 = arith.constant 0.000000e+00 : f32
    %10 = vector.broadcast %cst_10 : f32 to vector<2x2x128xf32>
    %c0_11 = arith.constant 0 : index
    %c18 = arith.constant 18 : index
    %c0_12 = arith.constant 0 : index
    %11 = vector.load %arg10[%c0_11, %c18, %c0_12] : memref<2x20x128xf32, #tpu.memory_space<vmem>>, vector<2x2x128xf32>
    tpu.vector_store %arg10[%c0_11, %c18, %c0_12], %10 {strides = array<i32>} : memref<2x20x128xf32, #tpu.memory_space<vmem>>, vector<2x2x128xf32>,
    %12 = vector.shape_cast %7 : vector<32x128xf32> to vector<2x16x128xf32>
    %c0_13 = arith.constant 0 : index
    %c2 = arith.constant 2 : index
    %c0_14 = arith.constant 0 : index
    %13 = vector.load %arg10[%c0_13, %c2, %c0_14] : memref<2x20x128xf32, #tpu.memory_space<vmem>>, vector<2x16x128xf32>
    tpu.vector_store %arg10[%c0_13, %c2, %c0_14], %12 {strides = array<i32>} : memref<2x20x128xf32, #tpu.memory_space<vmem>>, vector<2x16x128xf32>,
    %c0_15 = arith.constant 0 : index
    %c0_16 = arith.constant 0 : index
    %c0_17 = arith.constant 0 : index
    %14 = vector.load %arg10[%c0_15, %c0_16, %c0_17] : memref<2x20x128xf32, #tpu.memory_space<vmem>>, vector<2x16x128xf32>
    %c0_18 = arith.constant 0 : index
    %c1 = arith.constant 1 : index
    %c0_19 = arith.constant 0 : index
    %15 = vector.load %arg10[%c0_18, %c1, %c0_19] : memref<2x20x128xf32, #tpu.memory_space<vmem>>, vector<2x16x128xf32>
    %c0_20 = arith.constant 0 : index
    %c2_21 = arith.constant 2 : index
    %c0_22 = arith.constant 0 : index
    %16 = vector.load %arg10[%c0_20, %c2_21, %c0_22] : memref<2x20x128xf32, #tpu.memory_space<vmem>>, vector<2x16x128xf32>
    %c0_23 = arith.constant 0 : index
    %c3 = arith.constant 3 : index
    %c0_24 = arith.constant 0 : index
    %17 = vector.load %arg10[%c0_23, %c3, %c0_24] : memref<2x20x128xf32, #tpu.memory_space<vmem>>, vector<2x16x128xf32>
    %c0_25 = arith.constant 0 : index
    %c4 = arith.constant 4 : index
    %c0_26 = arith.constant 0 : index
    %18 = vector.load %arg10[%c0_25, %c4, %c0_26] : memref<2x20x128xf32, #tpu.memory_space<vmem>>, vector<2x16x128xf32>
    %19 = tpu.concatenate %14, %15, %16, %17, %18 in 2 : vector<2x16x128xf32>, vector<2x16x128xf32>, vector<2x16x128xf32>, vector<2x16x128xf32>, vector<2x16x128xf32> -> vector<2x16x640xf32>
    %20 = vector.shape_cast %19 : vector<2x16x640xf32> to vector<32x640xf32>
    %21 = arith.truncf %20 : vector<32x640xf32> to vector<32x640xbf16>
    %c0_27 = arith.constant 0 : index
    %c0_28 = arith.constant 0 : index
    %22 = vector.load %arg3[%c0_27, %c0_28] : memref<640x256xbf16, #tpu.memory_space<vmem>>, vector<640x256xbf16>
    %cst_29 = arith.constant dense<0.000000e+00> : vector<32x256xf32>
    %23 = tpu.matmul %21, %22, %cst_29 {dimension_numbers = #tpu.dot_dimension_numbers<[1], [0], [0], [1], [0, 0, 1, 1], [], []>} : vector<32x640xbf16>, vector<640x256xbf16>, vector<32x256xf32> -> vector<32x256xf32>
    %c0_30 = arith.constant 0 : index
    %c0_31 = arith.constant 0 : index
    %24 = vector.load %arg4[%c0_30, %c0_31] : memref<1x256xf32, #tpu.memory_space<vmem>>, vector<1x256xf32>
    %25 = vector.broadcast %24 : vector<1x256xf32> to vector<32x256xf32>
    %26 = arith.addf %23, %25 : vector<32x256xf32>
    %cst_32 = arith.constant 0.000000e+00 : f32
    %27 = vector.broadcast %cst_32 : f32 to vector<32x256xf32>
    %28 = arith.maximumf %26, %27 : vector<32x256xf32>
    %cst_33 = arith.constant 0.000000e+00 : f32
    %29 = vector.broadcast %cst_33 : f32 to vector<2x1x256xf32>
    %c0_34 = arith.constant 0 : index
    %c0_35 = arith.constant 0 : index
    %c0_36 = arith.constant 0 : index
    %30 = vector.load %arg11[%c0_34, %c0_35, %c0_36] : memref<2x18x256xf32, #tpu.memory_space<vmem>>, vector<2x1x256xf32>
    tpu.vector_store %arg11[%c0_34, %c0_35, %c0_36], %29 {strides = array<i32>} : memref<2x18x256xf32, #tpu.memory_space<vmem>>, vector<2x1x256xf32>,
    %cst_37 = arith.constant 0.000000e+00 : f32
    %31 = vector.broadcast %cst_37 : f32 to vector<2x1x256xf32>
    %c0_38 = arith.constant 0 : index
    %c17 = arith.constant 17 : index
    %c0_39 = arith.constant 0 : index
    %32 = vector.load %arg11[%c0_38, %c17, %c0_39] : memref<2x18x256xf32, #tpu.memory_space<vmem>>, vector<2x1x256xf32>
    tpu.vector_store %arg11[%c0_38, %c17, %c0_39], %31 {strides = array<i32>} : memref<2x18x256xf32, #tpu.memory_space<vmem>>, vector<2x1x256xf32>,
    %33 = vector.shape_cast %28 : vector<32x256xf32> to vector<2x16x256xf32>
    %c0_40 = arith.constant 0 : index
    %c1_41 = arith.constant 1 : index
    %c0_42 = arith.constant 0 : index
    %34 = vector.load %arg11[%c0_40, %c1_41, %c0_42] : memref<2x18x256xf32, #tpu.memory_space<vmem>>, vector<2x16x256xf32>
    tpu.vector_store %arg11[%c0_40, %c1_41, %c0_42], %33 {strides = array<i32>} : memref<2x18x256xf32, #tpu.memory_space<vmem>>, vector<2x16x256xf32>,
    %c0_43 = arith.constant 0 : index
    %c0_44 = arith.constant 0 : index
    %c0_45 = arith.constant 0 : index
    %35 = vector.load %arg11[%c0_43, %c0_44, %c0_45] : memref<2x18x256xf32, #tpu.memory_space<vmem>>, vector<2x16x256xf32>
    %c0_46 = arith.constant 0 : index
    %c1_47 = arith.constant 1 : index
    %c0_48 = arith.constant 0 : index
    %36 = vector.load %arg11[%c0_46, %c1_47, %c0_48] : memref<2x18x256xf32, #tpu.memory_space<vmem>>, vector<2x16x256xf32>
    %c0_49 = arith.constant 0 : index
    %c2_50 = arith.constant 2 : index
    %c0_51 = arith.constant 0 : index
    %37 = vector.load %arg11[%c0_49, %c2_50, %c0_51] : memref<2x18x256xf32, #tpu.memory_space<vmem>>, vector<2x16x256xf32>
    %38 = tpu.concatenate %35, %36, %37 in 2 : vector<2x16x256xf32>, vector<2x16x256xf32>, vector<2x16x256xf32> -> vector<2x16x768xf32>
    %39 = vector.shape_cast %38 : vector<2x16x768xf32> to vector<32x768xf32>
    %40 = arith.truncf %39 : vector<32x768xf32> to vector<32x768xbf16>
    %c0_52 = arith.constant 0 : index
    %c0_53 = arith.constant 0 : index
    %41 = vector.load %arg5[%c0_52, %c0_53] : memref<768x128xbf16, #tpu.memory_space<vmem>>, vector<768x128xbf16>
    %cst_54 = arith.constant dense<0.000000e+00> : vector<32x128xf32>
    %42 = tpu.matmul %40, %41, %cst_54 {dimension_numbers = #tpu.dot_dimension_numbers<[1], [0], [0], [1], [0, 0, 1, 1], [], []>} : vector<32x768xbf16>, vector<768x128xbf16>, vector<32x128xf32> -> vector<32x128xf32>
    %c0_55 = arith.constant 0 : index
    %c0_56 = arith.constant 0 : index
    %43 = vector.load %arg6[%c0_55, %c0_56] : memref<1x128xf32, #tpu.memory_space<vmem>>, vector<1x128xf32>
    %44 = vector.broadcast %43 : vector<1x128xf32> to vector<32x128xf32>
    %45 = arith.addf %42, %44 : vector<32x128xf32>
    %cst_57 = arith.constant 0.000000e+00 : f32
    %46 = vector.broadcast %cst_57 : f32 to vector<32x128xf32>
    %47 = arith.maximumf %45, %46 : vector<32x128xf32>
    %48 = vector.shape_cast %47 : vector<32x128xf32> to vector<2x16x128xf32>
    %cst_58 = arith.constant dense<0.000000e+00> : vector<2x128xf32>
    %49 = vector.multi_reduction <add>, %48, %cst_58 [1] : vector<2x16x128xf32> to vector<2x128xf32>
    %50 = arith.truncf %49 : vector<2x128xf32> to vector<2x128xbf16>
    %c0_59 = arith.constant 0 : index
    %c0_60 = arith.constant 0 : index
    %51 = vector.load %arg7[%c0_59, %c0_60] : memref<128x128xbf16, #tpu.memory_space<vmem>>, vector<128x128xbf16>
    %cst_61 = arith.constant dense<0.000000e+00> : vector<2x128xf32>
    %52 = tpu.matmul %50, %51, %cst_61 {dimension_numbers = #tpu.dot_dimension_numbers<[1], [0], [0], [1], [0, 0, 1, 1], [], []>} : vector<2x128xbf16>, vector<128x128xbf16>, vector<2x128xf32> -> vector<2x128xf32>
    %c0_62 = arith.constant 0 : index
    %c0_63 = arith.constant 0 : index
    %53 = vector.load %arg8[%c0_62, %c0_63] : memref<1x128xf32, #tpu.memory_space<vmem>>, vector<1x128xf32>
    %54 = vector.broadcast %53 : vector<1x128xf32> to vector<2x128xf32>
    %55 = arith.addf %52, %54 : vector<2x128xf32>
    %c0_64 = arith.constant 0 : index
    %c0_65 = arith.constant 0 : index
    %56 = vector.load %arg9[%c0_64, %c0_65] : memref<2x128xf32, #tpu.memory_space<vmem>>, vector<2x128xf32>
    tpu.vector_store %arg9[%c0_64, %c0_65], %55 {strides = array<i32>} : memref<2x128xf32, #tpu.memory_space<vmem>>, vector<2x128xf32>,
    return
  }
}

</mosaic_0001>

<bundles_post_ra>
// kernel: tpu_custom_call.1
= control target key start
LH: loop header
LB: loop body
LE: loop exit
PB: predicated region body
PF: predicated region fallthrough
CT: control target
= control target key end

     0   :  { %14 = vsyncpa [#allocation5], 0  ;;  %s2536_s0 = inlined_call_operand.hbm [shape: bf16[32,36], index: 0, kind: input, shape index: {}]   ;;  %s2537_s1 = inlined_call_operand.hbm [shape: bf16[36,128], index: 1, kind: input, shape index: {}]   ;;  %s2538_s2 = inlined_call_operand.vmem [shape: f32[1,128], index: 2, kind: input, shape index: {}]   ;;  %s2539_s3 = inlined_call_operand.hbm [shape: bf16[640,256], index: 3, kind: input, shape index: {}]   ;;  %s2540_s4 = inlined_call_operand.vmem [shape: f32[1,256], index: 4, kind: input, shape index: {}]   ;;  %s2541_s5 = inlined_call_operand.hbm [shape: bf16[768,128], index: 5, kind: input, shape index: {}]   ;;  %s2542_s6 = inlined_call_operand.vmem [shape: f32[1,128], index: 6, kind: input, shape index: {}]   ;;  %s2543_s7 = inlined_call_operand.hbm [shape: bf16[128,128], index: 7, kind: input, shape index: {}]   ;;  %s2544_s8 = inlined_call_operand.vmem [shape: f32[1,128], index: 8, kind: input, shape index: {}]   ;;  %s2545_s9 = inlined_call_operand.hbm [shape: f32[2,128], index: 9, kind: output, shape index: {}]  }
   0x1   :  { %15 = vsyncpa [#allocation8], 0 }
   0x2   :  { %16 = vsyncpa [#allocation11], 0 }
   0x3   :  { %17 = vsyncpa [#allocation6], 0  ;;  %s2370_s30 = smov [#allocation7]   ;;  %s2371_s11 = smov [#allocation10]  }
   0x4   :  { %s35_s10 = sshll.u32 %s2370_s30, 4  ;;  %s63_s12 = sshll.u32 %s2371_s11, 4  ;;  %s36_s10 = int_to_ptr.vmem [resolvable:$true] %s35_s10  ;;  %s64_s12 = int_to_ptr.vmem [resolvable:$true] %s63_s12 }
   0x5   :  { %s2250_s13 = scalar_lea.vmem %s36_s10, 320  ;;  %p2255_p1 = scmp.lt.s32.totalorder %s36_s10, %s36_s10 }
   0x6   :  { %p2251_p0 = scmp.ne.s32.totalorder %s36_s10, %s2250_s13  ;;  %p2256_p2 = scmp.lt.s32.totalorder %s2250_s13, %s2250_s13 }
   0x8   :  { %p2257_p3 = por %p2256_p2, %p2255_p1 }
   0xa   :  { %p2258_p4 = pnand %p2257_p3, %p2251_p0 }
   0xc   :  { %2261 = shalt.err (!%p2258_p4)
}
   0xd   :  { %s2372_s14 = smov 64   ;;  %s2373_s15 = smov 4  }
   0xe   :  { %41 = dma.hbm_to_vmem [thread:$0]  %s2537_s1, 320, %s36_s10, [#allocation8], %s2372_s14, %s2372_s14, %s2373_s15  }
   0xf   :  { %s2270_s18 = scalar_lea.vmem %s64_s12, 6144  ;;  %p2275_p6 = scmp.lt.s32.totalorder %s64_s12, %s64_s12 }
  0x10   :  { %p2271_p5 = scmp.ne.s32.totalorder %s64_s12, %s2270_s18  ;;  %p2276_p7 = scmp.lt.s32.totalorder %s2270_s18, %s2270_s18 }
  0x12   :  { %p2277_p8 = por %p2276_p7, %p2275_p6 }
  0x14   :  { %p2278_p9 = pnand %p2277_p8, %p2271_p5 }
  0x16   :  { %2281 = shalt.err (!%p2278_p9)
}
  0x17   :  { %69 = dma.hbm_to_vmem [thread:$0]  %s2541_s5, 6144, %s64_s12, [#allocation11], %s2372_s14, %s2372_s14, %s2373_s15  }
  0x18   :  { %s2374_s21 = smov [#allocation4]   ;;  %s2375_s23 = smov [#allocation9]  }
  0x19   :  { %s23_s22 = sshll.u32 %s2374_s21, 4  ;;  %s49_s24 = sshll.u32 %s2375_s23, 4  ;;  %s24_s22 = int_to_ptr.vmem [resolvable:$true] %s23_s22  ;;  %s50_s24 = int_to_ptr.vmem [resolvable:$true] %s49_s24 }
  0x1a   :  { %s2290_s1 = scalar_lea.vmem %s24_s22, 256  ;;  %p2295_p11 = scmp.lt.s32.totalorder %s24_s22, %s24_s22 }
  0x1b   :  { %p2291_p10 = scmp.ne.s32.totalorder %s24_s22, %s2290_s1  ;;  %p2296_p12 = scmp.lt.s32.totalorder %s2290_s1, %s2290_s1 }
  0x1d   :  { %p2297_p13 = por %p2296_p12, %p2295_p11 }
  0x1f   :  { %p2298_p0 = pnand %p2297_p13, %p2291_p10 }
  0x21   :  { %2301 = shalt.err (!%p2298_p0)
}
  0x22   :  { %29 = dma.hbm_to_vmem [thread:$0]  %s2536_s0, 256, %s24_s22, [#allocation5], %s2372_s14, %s2372_s14, %s2373_s15  }
  0x23   :  { %s2310_s5 = scalar_lea.vmem %s50_s24, 10240  ;;  %p2315_p2 = scmp.lt.s32.totalorder %s50_s24, %s50_s24 }
  0x24   :  { %p2311_p1 = scmp.ne.s32.totalorder %s50_s24, %s2310_s5  ;;  %p2316_p3 = scmp.lt.s32.totalorder %s2310_s5, %s2310_s5 }
  0x26   :  { %p2317_p4 = por %p2316_p3, %p2315_p2 }
  0x28   :  { %p2318_p5 = pnand %p2317_p4, %p2311_p1 }
  0x2a   :  { %2321 = shalt.err (!%p2318_p5)
}
  0x2b   :  { %s2376_s27 = smov 128   ;;  %s2377_s28 = smov 8  }
  0x2c   :  { %55 = dma.hbm_to_vmem [thread:$0]  %s2539_s3, 10240, %s50_s24, [#allocation8], %s2376_s27, %s2376_s27, %s2377_s28  }
  0x2d   :  { %s2378_s10 = smov [#allocation12]  }
  0x2e   :  { %s77_s11 = sshll.u32 %s2378_s10, 4  ;;  %s78_s11 = int_to_ptr.vmem [resolvable:$true] %s77_s11 }
  0x2f   :  { %s2330_s12 = scalar_lea.vmem %s78_s11, 1024  ;;  %p2335_p7 = scmp.lt.s32.totalorder %s78_s11, %s78_s11 }
  0x30   :  { %p2331_p6 = scmp.ne.s32.totalorder %s78_s11, %s2330_s12  ;;  %p2336_p8 = scmp.lt.s32.totalorder %s2330_s12, %s2330_s12 }
  0x32   :  { %p2337_p9 = por %p2336_p8, %p2335_p7 }
  0x34   :  { %p2338_p10 = pnand %p2337_p9, %p2331_p6 }
  0x36   :  { %2341 = shalt.err (!%p2338_p10)
}
  0x37   :  { %83 = dma.hbm_to_vmem [thread:$0]  %s2543_s7, 1024, %s78_s11, [#allocation11], %s2372_s14, %s2372_s14, %s2373_s15  }
  0x38   :  { %2362 = dma.done.wait [#allocation5], 256  }
  0x39   :  { %2363 = vsyncadd [#allocation5], 4294967040 }
  0x3a   :  { %2364 = dma.done.wait [#allocation8], 10560  }
  0x3b   :  { %2365 = vsyncadd [#allocation8], 4294956736 }
  0x3c   :  { %2366 = dma.done.wait [#allocation11], 7168  }
  0x3d   :  { %2367 = vsyncadd [#allocation11], 4294960128  ;;  %vm150_vm0 = vcmask 1041408   ;;  %v2061_v0 = vld [vmem:[#allocation7 + $0x10] ss:$0 sps:$4 sm:$0x33]  }
  0x3e   :  { %v2062_v1 = vld [vmem:[#allocation7 + $0x8] sm:$0xff]   ;;  %2047 = vmatprep.subr.msk.bf16.mxu0 %vm150_vm0, %v2061_v0  ;;  %v152_v2 = vsel %vm150_vm0, %v2061_v0, 0  ;;  %vm143_vm1 = vcmask 293888   ;;  %v2064_v3 = vld [vmem:[#allocation4] sm:$0xff]   ;;  %v2063_v4 = vld [vmem:[#allocation7] sm:$0xff]   ;;  %v2379_v58 = vmov 0.0  }
  0x3f   :  { %2018 = vmatpush3.bf16.msra.mxu0 %v152_v2  ;;  %2023 = vmatprep.mubr.msk.bf16.mxu0 %vm143_vm1, %v2064_v3  ;;  %v2066_v5 = vld [vmem:[#allocation9 + $0x74] ss:$8 sps:$4 sm:$0xff]   ;;  %v2068_v6 = vld [vmem:[#allocation9 + $0x70] ss:$8 sps:$4 sm:$0xff]   ;;  %v2072_v8 = vld [vmem:[#allocation9 + $0x64] ss:$8 sps:$4 sm:$0xff]  }
  0x40   :  { %2019 = vmatprep.subr.bf16.mxu0 %v2062_v1  ;;  %737 = vmatprep.subr.bf16.mxu1 %v2066_v5  ;;  %v2071_v7 = vld [vmem:[#allocation9 + $0x174] ss:$8 sps:$4 sm:$0xff]   ;;  %v2074_v9 = vld [vmem:[#allocation9 + $0x60] ss:$8 sps:$4 sm:$0xff]   ;;  %v2069_v12 = vld [vmem:[#allocation9 + $0x170] ss:$8 sps:$4 sm:$0xff]  }
  0x41   :  { %738 = vmatpush1.bf16.msra.mxu1 %v2068_v6  ;;  %v2065_v10 = vld [vmem:[#allocation4 + $0x8] sm:$0xff]   ;;  %v2078_v11 = vld [vmem:[#allocation9 + $0x54] ss:$8 sps:$4 sm:$0xff]   ;;  %v2080_v14 = vld [vmem:[#allocation9 + $0x50] ss:$8 sps:$4 sm:$0xff]   ;;  %vm927_vm3 = vcmask 1040384  }
  0x42   :  { %739 = vmatprep.subr.bf16.mxu1 %v2072_v8  ;;  %v2077_v13 = vld [vmem:[#allocation9 + $0x164] ss:$8 sps:$4 sm:$0xff]   ;;  %v2075_v16 = vld [vmem:[#allocation9 + $0x160] ss:$8 sps:$4 sm:$0xff]   ;;  %v2083_v17 = vld [vmem:[#allocation9 + $0x154] ss:$8 sps:$4 sm:$0xff]  }
  0x43   :  { %2020 = vmatpush3.bf16.msra.mxu0 %v2062_v1  ;;  %v2084_v15 = vld [vmem:[#allocation9 + $0x44] ss:$8 sps:$4 sm:$0xff]   ;;  %v2086_v18 = vld [vmem:[#allocation9 + $0x40] ss:$8 sps:$4 sm:$0xff]   ;;  %v2090_v19 = vld [vmem:[#allocation9 + $0x34] ss:$8 sps:$4 sm:$0xff]  }
  0x44   :  { %2021 = vmatprep.subr.bf16.mxu0 %v2063_v4  ;;  %v2081_v20 = vld [vmem:[#allocation9 + $0x150] ss:$8 sps:$4 sm:$0xff]   ;;  %v2089_v21 = vld [vmem:[#allocation9 + $0x144] ss:$8 sps:$4 sm:$0xff]   ;;  %v2087_v24 = vld [vmem:[#allocation9 + $0x140] ss:$8 sps:$4 sm:$0xff]  }
  0x45   :  { %740 = vmatpush1.bf16.msra.mxu1 %v2074_v9  ;;  %v2092_v22 = vld [vmem:[#allocation9 + $0x30] ss:$8 sps:$4 sm:$0xff]   ;;  %v2096_v23 = vld [vmem:[#allocation9 + $0x24] ss:$8 sps:$4 sm:$0xff]   ;;  %v2095_v25 = vld [vmem:[#allocation9 + $0x134] ss:$8 sps:$4 sm:$0xff]  }
  0x46   :  { %741 = vmatprep.subr.bf16.mxu1 %v2078_v11  ;;  %v2098_v26 = vld [vmem:[#allocation9 + $0x20] ss:$8 sps:$4 sm:$0xff]   ;;  %v2102_v27 = vld [vmem:[#allocation9 + $0x14] ss:$8 sps:$4 sm:$0xff]   ;;  %v2093_v28 = vld [vmem:[#allocation9 + $0x130] ss:$8 sps:$4 sm:$0xff]  }
  0x47   :  { %2022 = vmatpush3.bf16.msra.mxu0 %v2063_v4  ;;  %v2101_v29 = vld [vmem:[#allocation9 + $0x124] ss:$8 sps:$4 sm:$0xff]   ;;  %v2104_v30 = vld [vmem:[#allocation9 + $0x10] ss:$8 sps:$4 sm:$0xff]   ;;  %v2099_v32 = vld [vmem:[#allocation9 + $0x120] ss:$8 sps:$4 sm:$0xff]  }
  0x48   :  { %790 = vmatprep.subr.bf16.mxu0 %v2071_v7  ;;  %v2108_v31 = vld [vmem:[#allocation9 + $0x4] ss:$8 sps:$4 sm:$0xff]   ;;  %v2107_v33 = vld [vmem:[#allocation9 + $0x114] ss:$8 sps:$4 sm:$0xff]   ;;  %v2110_v34 = vld [vmem:[#allocation9] ss:$8 sps:$4 sm:$0xff]  }
  0x49   :  { %742 = vmatpush1.bf16.msra.mxu1 %v2080_v14  ;;  %v2105_v35 = vld [vmem:[#allocation9 + $0x110] ss:$8 sps:$4 sm:$0xff]   ;;  %v2114_v36 = vld [vmem:[#allocation9 + $0xf4] ss:$8 sps:$4 sm:$0xff]   ;;  %v2113_v37 = vld [vmem:[#allocation9 + $0x104] ss:$8 sps:$4 sm:$0xff]  }
  0x4a   :  { %2024 = vmatmul.mubr.msk.bf16.vlgmr.msra.gmra.mxu0 %vm143_vm1, %v2065_v10  ;;  %743 = vmatprep.subr.bf16.mxu1 %v2084_v15  ;;  %v2116_v38 = vld [vmem:[#allocation9 + $0xf0] ss:$8 sps:$4 sm:$0xff]   ;;  %v2120_v39 = vld [vmem:[#allocation9 + $0xe4] ss:$8 sps:$4 sm:$0xff]   ;;  %v2111_v40 = vld [vmem:[#allocation9 + $0x100] ss:$8 sps:$4 sm:$0xff]  }
  0x4b   :  { %791 = vmatpush1.bf16.msra.mxu0 %v2069_v12  ;;  %v2119_v41 = vld [vmem:[#allocation9 + $0x1f4] ss:$8 sps:$4 sm:$0xff]   ;;  %v2122_v42 = vld [vmem:[#allocation9 + $0xe0] ss:$8 sps:$4 sm:$0xff]   ;;  %v2117_v44 = vld [vmem:[#allocation9 + $0x1f0] ss:$8 sps:$4 sm:$0xff]  }
  0x4c   :  { %792 = vmatprep.subr.bf16.mxu0 %v2077_v13  ;;  %v2126_v43 = vld [vmem:[#allocation9 + $0xd4] ss:$8 sps:$4 sm:$0xff]   ;;  %v2125_v45 = vld [vmem:[#allocation9 + $0x1e4] ss:$8 sps:$4 sm:$0xff]   ;;  %v2128_v46 = vld [vmem:[#allocation9 + $0xd0] ss:$8 sps:$4 sm:$0xff]  }
  0x4d   :  { %744 = vmatpush1.bf16.msra.mxu1 %v2086_v18  ;;  %v2123_v47 = vld [vmem:[#allocation9 + $0x1e0] ss:$8 sps:$4 sm:$0xff]   ;;  %v2131_v48 = vld [vmem:[#allocation9 + $0x1d4] ss:$8 sps:$4 sm:$0xff]   ;;  %v2129_v49 = vld [vmem:[#allocation9 + $0x1d0] ss:$8 sps:$4 sm:$0xff]  }
  0x4e   :  { %745 = vmatprep.subr.bf16.mxu1 %v2090_v19  ;;  %v2132_v50 = vld [vmem:[#allocation9 + $0xc4] ss:$8 sps:$4 sm:$0xff]   ;;  %v2134_v51 = vld [vmem:[#allocation9 + $0xc0] ss:$8 sps:$4 sm:$0xff]   ;;  %v2138_v54 = vld [vmem:[#allocation9 + $0xb4] ss:$8 sps:$4 sm:$0xff]  }
  0x4f   :  { %793 = vmatpush1.bf16.msra.mxu0 %v2075_v16  ;;  %v2137_v52 = vld [vmem:[#allocation9 + $0x1c4] ss:$8 sps:$4 sm:$0xff]   ;;  %v2135_v53 = vld [vmem:[#allocation9 + $0x1c0] ss:$8 sps:$4 sm:$0xff]   ;;  %v2140_v55 = vld [vmem:[#allocation9 + $0xb0] ss:$8 sps:$4 sm:$0xff]  }
  0x50   :  { %794 = vmatprep.subr.bf16.mxu0 %v2083_v17  ;;  %v2143_v56 = vld [vmem:[#allocation9 + $0x1b4] ss:$8 sps:$4 sm:$0xff]   ;;  %v2141_v57 = vld [vmem:[#allocation9 + $0x1b0] ss:$8 sps:$4 sm:$0xff]   ;;  %207 = vst [vmem:[#allocation2] sm:$0x3] %v2379_v58 }
  0x51   :  { %746 = vmatpush1.bf16.msra.mxu1 %v2092_v22  ;;  %208 = vst [vmem:[#allocation2 + $0x18] sm:$0x3] %v2379_v58  ;;  %209 = vst [vmem:[#allocation2 + $0x12] sm:$0x3] %v2379_v58  ;;  %v2144_v59 = vld [vmem:[#allocation9 + $0xa4] ss:$8 sps:$4 sm:$0xff]  }
  0x52   :  { %747 = vmatprep.subr.bf16.mxu1 %v2096_v23  ;;  %210 = vst [vmem:[#allocation2 + $0x2a] sm:$0x3] %v2379_v58  ;;  %v2146_v60 = vld [vmem:[#allocation9 + $0xa0] ss:$8 sps:$4 sm:$0xff]   ;;  %v2149_v61 = vld [vmem:[#allocation9 + $0x1a4] ss:$8 sps:$4 sm:$0xff]  }
  0x53   :  { %795 = vmatpush1.bf16.msra.mxu0 %v2081_v20  ;;  %v2147_v62 = vld [vmem:[#allocation9 + $0x1a0] ss:$8 sps:$4 sm:$0xff]   ;;  %v2150_v63 = vld [vmem:[#allocation9 + $0x94] ss:$8 sps:$4 sm:$0xff]   ;;  %v2152_v0 = vld [vmem:[#allocation9 + $0x90] ss:$8 sps:$4 sm:$0xff]  }
  0x54   :  { %796 = vmatprep.subr.bf16.mxu0 %v2089_v21  ;;  %v2153_v1 = vld [vmem:[#allocation9 + $0x190] ss:$8 sps:$4 sm:$0xff]   ;;  %v2155_v2 = vld [vmem:[#allocation9 + $0x194] ss:$8 sps:$4 sm:$0xff]   ;;  %v2156_v3 = vld [vmem:[#allocation9 + $0x84] ss:$8 sps:$4 sm:$0xff]  }
  0x55   :  { %748 = vmatpush1.bf16.msra.mxu1 %v2098_v26  ;;  %v2161_v4 = vld [vmem:[#allocation9 + $0x184] ss:$8 sps:$4 sm:$0xff]   ;;  %v2158_v5 = vld [vmem:[#allocation9 + $0x80] ss:$8 sps:$4 sm:$0xff]   ;;  %v2164_v7 = vld [vmem:[#allocation9 + $0x274] ss:$8 sps:$4 sm:$0xff]  }
  0x56   :  { %749 = vmatprep.subr.bf16.mxu1 %v2102_v27  ;;  %v2159_v6 = vld [vmem:[#allocation9 + $0x180] ss:$8 sps:$4 sm:$0xff]   ;;  %v1773_v8 = vld [vmem:[%s2538_s2] ss:$0 sm:$0xff]  ;;  %v2162_v22 = vld [vmem:[#allocation9 + $0x270] ss:$8 sps:$4 sm:$0xff]  }
  0x57   :  { %797 = vmatpush1.bf16.msra.mxu0 %v2087_v24  ;;  %vm1000_vm4 = vcmask 1046528   ;;  %vm1037_vm5 = vcmask 1045504   ;;  %vm2381_vm6 = vmmov 0   ;;  %vm1663_vm7 = vcmask 1041409   ;;  %s2382_s17 = smov [#allocation13]  }
  0x58   :  { %798 = vmatprep.subr.bf16.mxu0 %v2095_v25  ;;  %s1762_s18 = sshll.u32 %s2382_s17, 4  ;;  %s1763_s18 = int_to_ptr.vmem [resolvable:$true] %s1762_s18 }
  0x59   :  { %750 = vmatpush1.bf16.msra.mxu1 %v2104_v30  ;;  %s2342_s19 = scalar_lea.vmem %s1763_s18, 32  ;;  %p2347_p12 = scmp.lt.s32.totalorder %s1763_s18, %s1763_s18 }
  0x5a   :  { %751 = vmatprep.subr.bf16.mxu1 %v2108_v31  ;;  %p2343_p11 = scmp.ne.s32.totalorder %s1763_s18, %s2342_s19  ;;  %p2348_p13 = scmp.lt.s32.totalorder %s2342_s19, %s2342_s19 }
  0x5b   :  { %799 = vmatpush1.bf16.msra.mxu0 %v2093_v28 }
  0x5c   :  { %800 = vmatprep.subr.bf16.mxu0 %v2101_v29  ;;  %p2349_p0 = por %p2348_p13, %p2347_p12 }
  0x5d   :  { %752 = vmatpush1.bf16.msra.mxu1 %v2110_v34 }
  0x5e   :  { %753 = vmatprep.subr.bf16.mxu1 %v2114_v36  ;;  %v2167_v36 = vld [vmem:[#allocation9 + $0x264] ss:$8 sps:$4 sm:$0xff]   ;;  %p2350_p1 = pnand %p2349_p0, %p2343_p11 }
  0x5f   :  { %801 = vmatpush1.bf16.msra.mxu0 %v2099_v32 }
  0x60   :  { %802 = vmatprep.subr.bf16.mxu0 %v2107_v33 }
  0x61   :  { %754 = vmatpush2.bf16.msra.mxu1 %v2116_v38 }
  0x62   :  { %755 = vmatprep.subr.bf16.mxu1 %v2120_v39  ;;  %v2165_v39 = vld [vmem:[#allocation9 + $0x260] ss:$8 sps:$4 sm:$0xff]  }
  0x63   :  { %803 = vmatpush1.bf16.msra.mxu0 %v2105_v35 }
  0x64   :  { %804 = vmatprep.subr.bf16.mxu0 %v2113_v37 }
  0x65   :  { %756 = vmatpush2.bf16.msra.mxu1 %v2122_v42  ;;  %v2168_v42 = vld [vmem:[#allocation9 + $0x250] ss:$8 sps:$4 sm:$0xff]  }
  0x66   :  { %757 = vmatprep.subr.bf16.mxu1 %v2126_v43 }
  0x67   :  { %805 = vmatpush1.bf16.msra.mxu0 %v2111_v40  ;;  %v2170_v40 = vld [vmem:[#allocation9 + $0x254] ss:$8 sps:$4 sm:$0xff]  }
  0x68   :  { %806 = vmatprep.subr.bf16.mxu0 %v2119_v41 }
  0x69   :  { %758 = vmatpush2.bf16.msra.mxu1 %v2128_v46  ;;  %v2173_v46 = vld [vmem:[#allocation9 + $0x244] ss:$8 sps:$4 sm:$0xff]  }
  0x6a   :  { %759 = vmatprep.subr.bf16.mxu1 %v2132_v50  ;;  %v2174_v50 = vld [vmem:[#allocation9 + $0x230] ss:$8 sps:$4 sm:$0xff]  }
  0x6b   :  { %807 = vmatpush2.bf16.msra.mxu0 %v2117_v44 }
  0x6c   :  { %808 = vmatprep.subr.bf16.mxu0 %v2125_v45 }
  0x6d   :  { %760 = vmatpush2.bf16.msra.mxu1 %v2134_v51  ;;  %v2179_v51 = vld [vmem:[#allocation9 + $0x224] ss:$8 sps:$4 sm:$0xff]  }
  0x6e   :  { %761 = vmatprep.subr.bf16.mxu1 %v2138_v54  ;;  %v2180_v54 = vld [vmem:[#allocation9 + $0x210] ss:$8 sps:$4 sm:$0xff]  }
  0x6f   :  { %809 = vmatpush2.bf16.msra.mxu0 %v2123_v47  ;;  %v2171_v47 = vld [vmem:[#allocation9 + $0x240] ss:$8 sps:$4 sm:$0xff]  }
  0x70   :  { %810 = vmatprep.subr.bf16.mxu0 %v2131_v48  ;;  %v2380_v48 = vmov 0  }
  0x71   :  { %762 = vmatpush2.bf16.msra.mxu1 %v2140_v55  ;;  %v2185_v55 = vld [vmem:[#allocation9 + $0x204] ss:$8 sps:$4 sm:$0xff]  }
  0x72   :  { %763 = vmatprep.subr.bf16.mxu1 %v2144_v59 }
  0x73   :  { %811 = vmatpush2.bf16.msra.mxu0 %v2129_v49  ;;  %v2176_v49 = vld [vmem:[#allocation9 + $0x234] ss:$8 sps:$4 sm:$0xff]  }
  0x74   :  { %812 = vmatprep.subr.bf16.mxu0 %v2137_v52  ;;  %v2177_v52 = vld [vmem:[#allocation9 + $0x220] ss:$8 sps:$4 sm:$0xff]  }
  0x75   :  { %764 = vmatpush2.bf16.msra.mxu1 %v2146_v60 }
  0x76   :  { %765 = vmatprep.subr.bf16.mxu1 %v2150_v63 }
  0x77   :  { %813 = vmatpush2.bf16.msra.mxu0 %v2135_v53  ;;  %v2182_v53 = vld [vmem:[#allocation9 + $0x214] ss:$8 sps:$4 sm:$0xff]  }
  0x78   :  { %814 = vmatprep.subr.bf16.mxu0 %v2143_v56  ;;  %v2183_v56 = vld [vmem:[#allocation9 + $0x200] ss:$8 sps:$4 sm:$0xff]  }
  0x79   :  { %766 = vmatpush2.bf16.msra.mxu1 %v2152_v0  ;;  %v327_v0 = vlaneseq }
  0x7a   :  { %767 = vmatprep.subr.bf16.mxu1 %v2156_v3  ;;  %v2188_v3 = vld [vmem:[#allocation10 + $0x70] sm:$0xff]  }
  0x7b   :  { %815 = vmatpush2.bf16.msra.mxu0 %v2141_v57  ;;  %vm906_vm2 = vcmp.lt.s32.totalorder %v327_v0, 256 }
  0x7c   :  { %816 = vmatprep.subr.bf16.mxu0 %v2149_v61  ;;  %908 = vst.msk [vmem:[#allocation3] ss:$8 sm:$0x3] %vm906_vm2, %v2379_v58  ;;  %911 = vst.msk [vmem:[#allocation3 + $0x30] ss:$8 sm:$0x3] %vm906_vm2, %v2379_v58 }
  0x7d   :  { %768 = vmatpush2.bf16.msra.mxu1 %v2158_v5  ;;  %914 = vst.msk [vmem:[#allocation3 + $0x21] ss:$8 sm:$0x3] %vm906_vm2, %v2379_v58  ;;  %917 = vst.msk [vmem:[#allocation3 + $0x51] ss:$8 sm:$0x3] %vm906_vm2, %v2379_v58 }
  0x7e   :  { %843 = vmatprep.subr.bf16.mxu1 %v2164_v7  ;;  %v2191_v5 = vld [vmem:[#allocation10 + $0xb8] sm:$0xff]   ;;  %v2192_v7 = vld [vmem:[#allocation10 + $0x68] sm:$0xff]  }
  0x7f   :  { %817 = vmatpush2.bf16.msra.mxu0 %v2147_v62 }
  0x80   :  { %818 = vmatprep.subr.bf16.mxu0 %v2155_v2  ;;  %v2187_v2 = vld [vmem:[#allocation10 + $0x38] sm:$0xff]  }
  0x83   :  { %819 = vmatpush2.bf16.msra.mxu0 %v2153_v1  ;;  %v2186_v1 = vld [vmem:[#allocation10 + $0x78] sm:$0xff]  }
  0x84   :  { %820 = vmatprep.subr.bf16.mxu0 %v2161_v4  ;;  %v2189_v4 = vld [vmem:[#allocation10 + $0xf8] sm:$0xff]  }
  0x87   :  { %821 = vmatpush2.bf16.msra.mxu0 %v2159_v6  ;;  %v2190_v6 = vld [vmem:[#allocation10 + $0x30] sm:$0xff]  }
  0x88   :  { %1924 = vmatprep.subr.bf16.mxu0 %v2186_v1 }
 0x10a   :  { %v2025_v9 = vpop.f32.mrf.mxu0 }
 0x10b   :  { %v197_v10 = vadd.f32 %v2025_v9, %v1773_v8  ;;  %v2193_v9 = vld [vmem:[#allocation10 + $0xf0] sm:$0xff]  }
 0x10c   :  { %v188_v11 = vpop.f32.mrf.mxu0 }
 0x10d   :  { %v205_v12 = vmax.f32 %v197_v10, 0.0  ;;  %v189_v13 = vadd.f32 %v1773_v8, %v188_v11  ;;  %v2196_v10 = vld [vmem:[#allocation10 + $0x60] sm:$0xff]   ;;  %v2195_v11 = vld [vmem:[#allocation10 + $0xb0] sm:$0xff]  }
 0x10e   :  { %v2026_v14 = vpop.f32.mrf.mxu0 }
 0x10f   :  { %213 = vst [vmem:[#allocation2 + $0x1a] sm:$0xff] %v205_v12  ;;  %v203_v15 = vmax.f32 %v189_v13, 0.0  ;;  %v200_v16 = vadd.f32 %v2026_v14, %v1773_v8  ;;  %v2197_v13 = vld [vmem:[#allocation10 + $0xe8] sm:$0xff]   ;;  %v2200_v14 = vld [vmem:[#allocation10 + $0x58] sm:$0xff]  }
 0x110   :  { %v191_v17 = vpop.f32.mrf.mxu0 }
 0x111   :  { %211 = vst [vmem:[#allocation2 + $0x2] sm:$0xff] %v203_v15  ;;  %v206_v18 = vmax.f32 %v200_v16, 0.0  ;;  %v192_v19 = vadd.f32 %v1773_v8, %v191_v17  ;;  %v2194_v8 = vld [vmem:[#allocation10 + $0x28] sm:$0xff]   ;;  %v2202_v16 = vld [vmem:[#allocation10 + $0x18] sm:$0xff]   ;;  %v2201_v17 = vld [vmem:[#allocation10 + $0xe0] sm:$0xff]  }
 0x113   :  { %214 = vst [vmem:[#allocation2 + $0x22] sm:$0xff] %v206_v18  ;;  %v204_v20 = vmax.f32 %v192_v19, 0.0  ;;  %v242_v45 = vpack.c.bf16 %v206_v18, %v205_v12  ;;  %v2198_v12 = vld [vmem:[#allocation10 + $0x20] sm:$0xff]   ;;  %v2204_v18 = vld [vmem:[#allocation10 + $0x50] sm:$0xff]  }
 0x114   :  { %v2203_v19 = vld [vmem:[#allocation10 + $0xa0] sm:$0xff]  }
 0x115   :  { %212 = vst [vmem:[#allocation2 + $0xa] sm:$0xff] %v204_v20  ;;  %v237_v34 = vpack.c.bf16 %v204_v20, %v203_v15  ;;  %v2199_v15 = vld [vmem:[#allocation10 + $0xa8] sm:$0xff]   ;;  %v2206_v20 = vld [vmem:[#allocation10 + $0x10] sm:$0xff]  }
 0x116   :  { %v221_v35 = vld [vmem:[#allocation2 + $0x19] sm:$0xff] }
 0x117   :  { %v217_v43 = vld [vmem:[#allocation2 + $0x18] sm:$0xff] }
 0x118   :  { %v219_v21 = vld [vmem:[#allocation2 + $0x1] sm:$0xff] }
 0x119   :  { %v215_v23 = vld [vmem:[#allocation2] sm:$0xff] }
 0x11a   :  { %v222_v24 = vld [vmem:[#allocation2 + $0x21] sm:$0xff] }
 0x11b   :  { %v229_v31 = vld [vmem:[#allocation2 + $0x1b] sm:$0xff]  ;;  %v230_v32 = vld [vmem:[#allocation2 + $0x23] sm:$0xff]  ;;  %v241_v37 = vpack.c.bf16 %v222_v24, %v221_v35 }
 0x11c   :  { %v220_v25 = vld [vmem:[#allocation2 + $0x9] sm:$0xff]  ;;  %v243_v38 = vpack.c.bf16 %v230_v32, %v229_v31  ;;  %v218_v41 = vld [vmem:[#allocation2 + $0x20] sm:$0xff]  ;;  %v2216_v32 = vld [vmem:[#allocation10 + $0xc0] sm:$0xff]  }
 0x11d   :  { %v227_v26 = vld [vmem:[#allocation2 + $0x3] sm:$0xff]  ;;  %v228_v27 = vld [vmem:[#allocation2 + $0xb] sm:$0xff]  ;;  %v236_v28 = vpack.c.bf16 %v220_v25, %v219_v21  ;;  %v240_v44 = vpack.c.bf16 %v218_v41, %v217_v43  ;;  %v325_v43 = vld [vmem:[%s2540_s4] sm:$0x3] }
 0x11e   :  { %v238_v29 = vpack.c.bf16 %v228_v27, %v227_v26  ;;  %v216_v30 = vld [vmem:[#allocation2 + $0x8] sm:$0xff]  ;;  %v233_v61 = vld [vmem:[#allocation2 + $0x1c] sm:$0xff]  ;;  %v2212_v26 = vld [vmem:[#allocation10 + $0x40] sm:$0xff]  }
 0x11f   :  { %v235_v33 = vpack.c.bf16 %v216_v30, %v215_v23  ;;  %769 = vmatprep.mubr.bf16.mxu1 %v236_v28  ;;  %v231_v57 = vld [vmem:[#allocation2 + $0x4] sm:$0xff]  ;;  %v232_v59 = vld [vmem:[#allocation2 + $0xc] sm:$0xff]  ;;  %v2210_v24 = vld [vmem:[#allocation10 + $0x8] sm:$0xff]  }
 0x120   :  { %822 = vmatprep.mubr.bf16.mxu0 %v238_v29  ;;  %v239_v60 = vpack.c.bf16 %v232_v59, %v231_v57  ;;  %v234_v62 = vld [vmem:[#allocation2 + $0x24] sm:$0xff]  ;;  %v2205_v21 = vld [vmem:[#allocation10 + $0xd8] sm:$0xff]   ;;  %v2214_v28 = vld [vmem:[#allocation10] sm:$0xff]  }
 0x121   :  { %770 = vmatmul.mubr.bf16.vlgmr.msra.gmra.mxu1 %v235_v33  ;;  %823 = vmatmul.mubr.bf16.vlgmr.msra.gmra.mxu0 %v237_v34  ;;  %v244_v63 = vpack.c.bf16 %v234_v62, %v233_v61  ;;  %v2207_v23 = vld [vmem:[#allocation10 + $0x98] sm:$0xff]   ;;  %v2209_v25 = vld [vmem:[#allocation10 + $0xd0] sm:$0xff]   ;;  %v2213_v29 = vld [vmem:[#allocation10 + $0xc8] sm:$0xff]  }
 0x122   :  { %844 = vmatpush1.bf16.msra.mxu1 %v2162_v22  ;;  %779 = vmatprep.mubr.bf16.mxu1 %v241_v37  ;;  %v2208_v22 = vld [vmem:[#allocation10 + $0x48] sm:$0xff]   ;;  %v2211_v27 = vld [vmem:[#allocation10 + $0x90] sm:$0xff]   ;;  %v2217_v30 = vld [vmem:[#allocation10 + $0x178] sm:$0xff]  }
 0x123   :  { %832 = vmatprep.mubr.bf16.mxu0 %v243_v38  ;;  %845 = vmatprep.subr.bf16.mxu1 %v2167_v36  ;;  %v2215_v31 = vld [vmem:[#allocation10 + $0x88] sm:$0xff]   ;;  %v2218_v33 = vld [vmem:[#allocation10 + $0x80] sm:$0xff]   ;;  %v328_v38 = vshrl.u32 %v327_v0, 7 }
 0x124   :  { %1925 = vmatpush3.bf16.msra.mxu0 %v2187_v2 }
 0x125   :  { %1926 = vmatprep.subr.bf16.mxu0 %v2188_v3  ;;  %v329_v41 = vsub.s32 0, %v328_v38 }
 0x126   :  { %846 = vmatpush1.bf16.msra.mxu1 %v2165_v39 }
 0x127   :  { %847 = vmatprep.subr.bf16.mxu1 %v2170_v40 }
 0x128   :  { %1927 = vmatpush3.bf16.msra.mxu0 %v2190_v6 }
 0x129   :  { %780 = vmatmul.mubr.bf16.gmra.mxu1 %v240_v44  ;;  %833 = vmatmul.mubr.bf16.gmra.mxu0 %v242_v45  ;;  %v333_v44 = vsub.s32 1, %v328_v38 }
 0x12a   :  { %848 = vmatpush1.bf16.msra.mxu1 %v2168_v42  ;;  %875 = vmatprep.mubr.bf16.mxu1 %v2380_v48 }
 0x12b   :  { %849 = vmatprep.subr.bf16.mxu1 %v2173_v46  ;;  %1928 = vmatprep.subr.bf16.mxu0 %v2192_v7  ;;  %v330_v46 = vrot.slane %v325_v43, %v329_v41 }
 0x12c   :  { %1929 = vmatpush3.bf16.msra.mxu0 %v2194_v8 }
 0x12d   :  { %1930 = vmatprep.subr.bf16.mxu0 %v2196_v10 }
 0x12e   :  { %850 = vmatpush1.bf16.msra.mxu1 %v2171_v47 }
 0x12f   :  { %851 = vmatprep.subr.bf16.mxu1 %v2176_v49 }
 0x130   :  { %1931 = vmatpush3.bf16.msra.mxu0 %v2198_v12 }
 0x131   :  { %1932 = vmatprep.subr.bf16.mxu0 %v2200_v14 }
 0x132   :  { %852 = vmatpush1.bf16.msra.mxu1 %v2174_v50 }
 0x133   :  { %853 = vmatprep.subr.bf16.mxu1 %v2179_v51 }
 0x134   :  { %1933 = vmatpush3.bf16.msra.mxu0 %v2202_v16 }
 0x135   :  { %1934 = vmatprep.subr.bf16.mxu0 %v2204_v18 }
 0x136   :  { %854 = vmatpush1.bf16.msra.mxu1 %v2177_v52 }
 0x137   :  { %855 = vmatprep.subr.bf16.mxu1 %v2182_v53 }
 0x138   :  { %1935 = vmatpush3.bf16.msra.mxu0 %v2206_v20 }
 0x139   :  { %1936 = vmatprep.subr.bf16.mxu0 %v2208_v22 }
 0x13a   :  { %856 = vmatpush1.bf16.msra.mxu1 %v2180_v54 }
 0x13b   :  { %857 = vmatprep.subr.bf16.mxu1 %v2185_v55 }
 0x13c   :  { %1937 = vmatpush3.bf16.msra.mxu0 %v2210_v24 }
 0x13d   :  { %1938 = vmatprep.subr.bf16.mxu0 %v2212_v26 }
 0x13e   :  { %858 = vmatpush1.bf16.msra.mxu1 %v2183_v56 }
 0x13f   :  { %1952 = vmatprep.subr.bf16.mxu1 %v2189_v4 }
 0x140   :  { %1939 = vmatpush3.bf16.msra.mxu0 %v2214_v28 }
 0x141   :  { %876 = vmatmul.mubr.bf16.vlgmr.msra.gmra.mxu1 %v239_v60  ;;  %1980 = vmatprep.subr.bf16.mxu0 %v2217_v30 }
 0x142   :  { %885 = vmatprep.mubr.bf16.mxu1 %v2380_v48  ;;  %1953 = vmatpush3.bf16.msra.mxu1 %v2191_v5  ;;  %v334_v48 = vrot.slane %v325_v43, %v333_v44 }
 0x143   :  { %1954 = vmatprep.subr.bf16.mxu1 %v2193_v9 }
 0x146   :  { %1955 = vmatpush3.bf16.msra.mxu1 %v2195_v11 }
 0x147   :  { %1956 = vmatprep.subr.bf16.mxu1 %v2197_v13 }
 0x149   :  { %886 = vmatmul.mubr.bf16.gmra.mxu1 %v244_v63 }
 0x14a   :  { %1957 = vmatpush3.bf16.msra.mxu1 %v2199_v15 }
 0x14b   :  { %1958 = vmatprep.subr.bf16.mxu1 %v2201_v17 }
 0x14e   :  { %1959 = vmatpush3.bf16.msra.mxu1 %v2203_v19 }
 0x14f   :  { %1960 = vmatprep.subr.bf16.mxu1 %v2205_v21 }
 0x152   :  { %1961 = vmatpush3.bf16.msra.mxu1 %v2207_v23 }
 0x153   :  { %1962 = vmatprep.subr.bf16.mxu1 %v2209_v25 }
 0x156   :  { %1963 = vmatpush3.bf16.msra.mxu1 %v2211_v27 }
 0x157   :  { %1964 = vmatprep.subr.bf16.mxu1 %v2213_v29 }
 0x15a   :  { %1965 = vmatpush3.bf16.msra.mxu1 %v2215_v31 }
 0x15b   :  { %1966 = vmatprep.subr.bf16.mxu1 %v2216_v32 }
 0x15e   :  { %1967 = vmatpush3.bf16.msra.mxu1 %v2218_v33 }
 0x15f   :  { %2027 = vmatprep.subr.bf16.mxu1 %v2379_v58 }
 0x1e1   :  { %v771_v34 = vpop.f32.mrf.mxu1  ;;  %v824_v39 = vpop.f32.mrf.mxu0 }
 0x1e2   :  { %v772_v50 = vadd.f32 %v771_v34, %v330_v46 }
 0x1e3   :  { %v773_v35 = vpop.f32.mrf.mxu1  ;;  %v826_v42 = vpop.f32.mrf.mxu0 }
 0x1e4   :  { %v774_v52 = vadd.f32 %v773_v35, %v334_v48  ;;  %v825_v54 = vadd.f32 %v824_v39, %v772_v50  ;;  %v2220_v50 = vld [vmem:[#allocation10 + $0x170] sm:$0xff]  }
 0x1e5   :  { %v775_v36 = vpop.f32.mrf.mxu1  ;;  %v828_v47 = vpop.f32.mrf.mxu0 }
 0x1e6   :  { %v776_v55 = vadd.f32 %v775_v36, %v330_v46  ;;  %v827_v60 = vadd.f32 %v826_v42, %v774_v52 }
 0x1e7   :  { %v777_v37 = vpop.f32.mrf.mxu1  ;;  %v830_v51 = vpop.f32.mrf.mxu0 }
 0x1e8   :  { %v778_v57 = vadd.f32 %v777_v37, %v334_v48  ;;  %v829_v63 = vadd.f32 %v828_v47, %v776_v55 }
 0x1e9   :  { %v781_v40 = vpop.f32.mrf.mxu1  ;;  %v834_v56 = vpop.f32.mrf.mxu0 }
 0x1ea   :  { %v782_v0 = vadd.f32 %v781_v40, %v330_v46  ;;  %v831_v4 = vadd.f32 %v830_v51, %v778_v57 }
 0x1eb   :  { %v783_v45 = vpop.f32.mrf.mxu1  ;;  %v836_v1 = vpop.f32.mrf.mxu0 }
 0x1ec   :  { %v784_v6 = vadd.f32 %v783_v45, %v334_v48  ;;  %v835_v12 = vadd.f32 %v834_v56, %v782_v0  ;;  %v2221_v0 = vld [vmem:[#allocation10 + $0x130] sm:$0xff]  }
 0x1ed   :  { %v785_v49 = vpop.f32.mrf.mxu1  ;;  %v838_v13 = vpop.f32.mrf.mxu0 }
 0x1ee   :  { %v786_v10 = vadd.f32 %v785_v49, %v330_v46  ;;  %v837_v19 = vadd.f32 %v836_v1, %v784_v6  ;;  %v2219_v46 = vld [vmem:[#allocation10 + $0x138] sm:$0xff]  }
 0x1ef   :  { %v787_v53 = vpop.f32.mrf.mxu1  ;;  %v840_v25 = vpop.f32.mrf.mxu0 }
 0x1f0   :  { %v788_v17 = vadd.f32 %v787_v53, %v334_v48  ;;  %v839_v23 = vadd.f32 %v838_v13, %v786_v10 }
 0x1f2   :  { %v841_v30 = vadd.f32 %v840_v25, %v788_v17 }
 0x201   :  { %v877_v59 = vpop.f32.mrf.mxu1 }
 0x202   :  { %v878_v61 = vadd.f32 %v877_v59, %v825_v54 }
 0x203   :  { %v879_v62 = vpop.f32.mrf.mxu1 }
 0x204   :  { %v896_v2 = vmax.f32 %v878_v61, 0.0  ;;  %v880_v3 = vadd.f32 %v879_v62, %v827_v60 }
 0x205   :  { %v881_v5 = vpop.f32.mrf.mxu1 }
 0x206   :  { %v928_v7 = vrot.slane %v896_v2, 7  ;;  %v897_v8 = vmax.f32 %v880_v3, 0.0  ;;  %v882_v9 = vadd.f32 %v881_v5, %v829_v63 }
 0x207   :  { %v883_v11 = vpop.f32.mrf.mxu1 }
 0x208   :  { %952 = vst [vmem:[#allocation3] sm:$0xfe] %v928_v7  ;;  %v929_v14 = vrot.slane %v897_v8, 7  ;;  %v898_v15 = vmax.f32 %v882_v9, 0.0  ;;  %v884_v16 = vadd.f32 %v883_v11, %v831_v4  ;;  %v2222_v4 = vld [vmem:[#allocation10 + $0x168] sm:$0xff]  }
 0x209   :  { %v887_v18 = vpop.f32.mrf.mxu1 }
 0x20a   :  { %953 = vst [vmem:[#allocation3 + $0x8] sm:$0xfe] %v929_v14  ;;  %v930_v20 = vrot.slane %v898_v15, 7  ;;  %v899_v21 = vmax.f32 %v884_v16, 0.0  ;;  %v888_v22 = vadd.f32 %v887_v18, %v835_v12  ;;  %v2223_v16 = vld [vmem:[#allocation10 + $0x128] sm:$0xff]  }
 0x20b   :  { %v889_v24 = vpop.f32.mrf.mxu1 }
 0x20c   :  { %v2480_v26 = vsel %vm927_vm3, %v928_v7, %v930_v20  ;;  %956 = vst [vmem:[#allocation3 + $0x20] sm:$0x1] %v930_v20  ;;  %v932_v27 = vrot.slane %v899_v21, 7  ;;  %v900_v28 = vmax.f32 %v888_v22, 0.0  ;;  %v890_v29 = vadd.f32 %v889_v24, %v837_v19  ;;  %v2224_v21 = vld [vmem:[#allocation10 + $0x160] sm:$0xff]  }
 0x20d   :  { %v891_v31 = vpop.f32.mrf.mxu1  ;;  %v1002_v56 = vrot.slane %v2480_v26, 1 }
 0x20e   :  { %v2483_v32 = vsel %vm927_vm3, %v929_v14, %v932_v27  ;;  %957 = vst [vmem:[#allocation3 + $0x28] sm:$0x1] %v932_v27  ;;  %v934_v33 = vrot.slane %v900_v28, 7  ;;  %v901_v34 = vmax.f32 %v890_v29, 0.0  ;;  %v892_v35 = vadd.f32 %v891_v31, %v839_v23  ;;  %v2225_v31 = vld [vmem:[#allocation10 + $0x120] sm:$0xff]  }
 0x20f   :  { %v893_v36 = vpop.f32.mrf.mxu1  ;;  %v964_v40 = vld [vmem:[#allocation3] sm:$0xff]  ;;  %v1005_v62 = vrot.slane %v2483_v32, 1  ;;  %v1042_v2 = vrot.slane %v2483_v32, 2 }
 0x210   :  { %958 = vst [vmem:[#allocation3 + $0x30] sm:$0xfe] %v934_v33  ;;  %v935_v37 = vrot.slane %v901_v34, 7  ;;  %v902_v38 = vmax.f32 %v892_v35, 0.0  ;;  %v894_v39 = vadd.f32 %v893_v36, %v841_v30  ;;  %v972_v47 = vld [vmem:[#allocation3] sm:$0xfe]  ;;  %v1066_v48 = vpack.c.bf16 %v2480_v26, %v964_v40 }
 0x211   :  { %v965_v41 = vld [vmem:[#allocation3 + $0x8] sm:$0xff]  ;;  %v1001_v59 = vrot.slane %v972_v47, 1  ;;  %v2228_v40 = vld [vmem:[#allocation10 + $0x150] sm:$0xff]   ;;  %v980_v47 = vld [vmem:[#allocation3] sm:$0xfc] }
 0x212   :  { %v973_v42 = vld [vmem:[#allocation3 + $0x8] sm:$0xfe]  ;;  %959 = vst [vmem:[#allocation3 + $0x38] sm:$0xfe] %v935_v37  ;;  %v936_v43 = vrot.slane %v902_v38, 7  ;;  %v903_v44 = vmax.f32 %v894_v39, 0.0  ;;  %v1067_v45 = vpack.c.bf16 %v2483_v32, %v965_v41 }
 0x213   :  { %v974_v49 = vld [vmem:[#allocation3 + $0x20] sm:$0x1]  ;;  %v1004_v53 = vrot.slane %v973_v42, 1  ;;  %v981_v55 = vld [vmem:[#allocation3 + $0x8] sm:$0xfc]  ;;  %v1003_v10 = vsel %vm1000_vm4, %v1001_v59, %v1002_v56  ;;  %v2229_v41 = vld [vmem:[#allocation10 + $0x110] sm:$0xff]  }
 0x214   :  { %v2488_v51 = vsel %vm927_vm3, %v934_v33, %v936_v43  ;;  %962 = vst [vmem:[#allocation3 + $0x50] sm:$0x1] %v936_v43  ;;  %v938_v52 = vrot.slane %v903_v44, 7  ;;  %1501 = vmatprep.mubr.bf16.mxu0 %v1067_v45  ;;  %v1007_v54 = vrot.slane %v974_v49, 1  ;;  %v1041_v5 = vrot.slane %v981_v55, 2  ;;  %v2226_v33 = vld [vmem:[#allocation10 + $0x158] sm:$0xff]  }
 0x215   :  { %1502 = vmatmul.mubr.bf16.vlgmr.msra.gmra.mxu0 %v1066_v48  ;;  %v975_v57 = vld [vmem:[#allocation3 + $0x28] sm:$0x1]  ;;  %v1006_v6 = vsel %vm1000_vm4, %v1004_v53, %v1005_v62  ;;  %v1012_v25 = vrot.slane %v2488_v51, 1  ;;  %v2227_v39 = vld [vmem:[#allocation10 + $0x118] sm:$0xff]   ;;  %v2230_v42 = vld [vmem:[#allocation10 + $0x148] sm:$0xff]  }
 0x216   :  { %v983_v60 = vld [vmem:[#allocation3 + $0x28] sm:$0x3]  ;;  %v2492_v61 = vsel %vm927_vm3, %v935_v37, %v938_v52  ;;  %963 = vst [vmem:[#allocation3 + $0x58] sm:$0x1] %v938_v52  ;;  %1981 = vmatpush3.bf16.msra.mxu0 %v2219_v46  ;;  %v1009_v63 = vrot.slane %v975_v57, 1  ;;  %v1008_v3 = vsel %vm1000_vm4, %v1002_v56, %v1007_v54  ;;  %v1043_v19 = vsel %vm1037_vm5, %v1041_v5, %v1042_v2  ;;  %v2231_v44 = vld [vmem:[#allocation10 + $0x108] sm:$0xff]  }
 0x217   :  { %v1046_v1 = vrot.slane %v983_v60, 2  ;;  %1982 = vmatprep.subr.bf16.mxu0 %v2220_v50  ;;  %v968_v8 = vld [vmem:[#allocation3 + $0x30] sm:$0xff]  ;;  %v1068_v14 = vpack.c.bf16 %v1008_v3, %v1003_v10  ;;  %v1015_v29 = vrot.slane %v2492_v61, 1  ;;  %v982_v43 = vld [vmem:[#allocation3 + $0x20] sm:$0x3]  ;;  %v2232_v46 = vld [vmem:[#allocation10 + $0x140] sm:$0xff]  }
 0x218   :  { %v1010_v7 = vsel %vm1000_vm4, %v1005_v62, %v1009_v63  ;;  %v976_v17 = vld [vmem:[#allocation3 + $0x30] sm:$0xfe]  ;;  %v1072_v18 = vpack.c.bf16 %v2488_v51, %v968_v8  ;;  %v1044_v48 = vrot.slane %v982_v43, 2  ;;  %v1039_v52 = vrot.slane %v2480_v26, 2  ;;  %v2233_v53 = vld [vmem:[#allocation10 + $0x100] sm:$0xff]   ;;  %v2238_v10 = vld [vmem:[#allocation12 + $0x18] sm:$0xff]  }
 0x219   :  { %v1069_v9 = vpack.c.bf16 %v1010_v7, %v1006_v6  ;;  %v969_v11 = vld [vmem:[#allocation3 + $0x38] sm:$0xff]  ;;  %v1047_v12 = vsel %vm1037_vm5, %v1042_v2, %v1046_v1  ;;  %v1011_v28 = vrot.slane %v976_v17, 1  ;;  %v1038_v54 = vrot.slane %v980_v47, 2  ;;  %v984_v1 = vld [vmem:[#allocation3 + $0x30] sm:$0xfc] }
 0x21a   :  { %v977_v13 = vld [vmem:[#allocation3 + $0x38] sm:$0xfe]  ;;  %1983 = vmatpush3.bf16.msra.mxu0 %v2221_v0  ;;  %v1073_v15 = vpack.c.bf16 %v2492_v61, %v969_v11  ;;  %v1071_v22 = vpack.c.bf16 %v1047_v12, %v1043_v19  ;;  %v1052_v55 = vrot.slane %v2492_v61, 2  ;;  %v1045_v57 = vsel %vm1037_vm5, %v1039_v52, %v1044_v48  ;;  %v2240_v12 = vld [vmem:[#allocation12 + $0x8] sm:$0xff]  }
 0x21b   :  { %1550 = vmatprep.mubr.bf16.mxu1 %v1069_v9  ;;  %1984 = vmatprep.subr.bf16.mxu0 %v2222_v4  ;;  %v978_v20 = vld [vmem:[#allocation3 + $0x50] sm:$0x1]  ;;  %v1014_v23 = vrot.slane %v977_v13, 1  ;;  %v1013_v37 = vsel %vm1000_vm4, %v1011_v28, %v1012_v25  ;;  %v985_v49 = vld [vmem:[#allocation3 + $0x38] sm:$0xfc]  ;;  %v1040_v62 = vsel %vm1037_vm5, %v1038_v54, %v1039_v52  ;;  %v1049_v3 = vrot.slane %v2488_v51, 2 }
 0x21c   :  { %1551 = vmatmul.mubr.bf16.vlgmr.msra.gmra.mxu1 %v1068_v14  ;;  %1509 = vmatprep.mubr.bf16.mxu0 %v1073_v15  ;;  %v1017_v24 = vrot.slane %v978_v20, 1  ;;  %v1051_v56 = vrot.slane %v985_v49, 2  ;;  %v986_v60 = vld [vmem:[#allocation3 + $0x50] sm:$0x3]  ;;  %v1070_v63 = vpack.c.bf16 %v1045_v57, %v1040_v62  ;;  %v1048_v61 = vrot.slane %v984_v1, 2  ;;  %v2234_v7 = vld [vmem:[#allocation12 + $0x38] sm:$0xff]  }
 0x21d   :  { %1510 = vmatmul.mubr.bf16.gmra.mxu0 %v1072_v18  ;;  %v979_v27 = vld [vmem:[#allocation3 + $0x58] sm:$0x1]  ;;  %v1016_v34 = vsel %vm1000_vm4, %v1014_v23, %v1015_v29  ;;  %v1054_v2 = vrot.slane %v986_v60, 2  ;;  %2028 = vmatpush3.bf16.msra.mxu1 %v2234_v7  ;;  %v2236_v9 = vld [vmem:[#allocation12 + $0x28] sm:$0xff]   ;;  %v2237_v51 = vld [vmem:[#allocation12 + $0x20] sm:$0xff]  }
 0x21e   :  { %1985 = vmatpush3.bf16.msra.mxu0 %v2223_v16  ;;  %1599 = vmatprep.mubr.bf16.mxu0 %v1071_v22  ;;  %v1019_v30 = vrot.slane %v979_v27, 1  ;;  %v1018_v32 = vsel %vm1000_vm4, %v1012_v25, %v1017_v24  ;;  %v987_v45 = vld [vmem:[#allocation3 + $0x58] sm:$0x3]  ;;  %v1053_v0 = vsel %vm1037_vm5, %v1051_v56, %v1052_v55  ;;  %v1050_v5 = vsel %vm1037_vm5, %v1048_v61, %v1049_v3  ;;  %v2241_v13 = vld [vmem:[#allocation12] sm:$0xff]  }
 0x21f   :  { %1986 = vmatprep.subr.bf16.mxu0 %v2224_v21  ;;  %v1074_v38 = vpack.c.bf16 %v1018_v32, %v1013_v37  ;;  %v1056_v50 = vrot.slane %v987_v45, 2  ;;  %v1055_v4 = vsel %vm1037_vm5, %v1049_v3, %v1054_v2  ;;  %2029 = vmatprep.subr.bf16.mxu1 %v2379_v58  ;;  %v2235_v8 = vld [vmem:[#allocation12 + $0x30] sm:$0xff]  }
 0x220   :  { %v1020_v35 = vsel %vm1000_vm4, %v1015_v29, %v1019_v30  ;;  %v1076_v6 = vpack.c.bf16 %v1055_v4, %v1050_v5  ;;  %v2239_v11 = vld [vmem:[#allocation12 + $0x10] sm:$0xff]   ;;  %v1861_v29 = vld [vmem:[%s2542_s6] ss:$0 sm:$0xff] }
 0x221   :  { %v1075_v36 = vpack.c.bf16 %v1020_v35, %v1016_v34  ;;  %v1057_v59 = vsel %vm1037_vm5, %v1052_v55, %v1056_v50  ;;  %2030 = vmatpush3.bf16.msra.mxu1 %v2235_v8 }
 0x222   :  { %1987 = vmatpush3.bf16.msra.mxu0 %v2225_v31  ;;  %v1077_v26 = vpack.c.bf16 %v1057_v59, %v1053_v0  ;;  %2031 = vmatprep.subr.bf16.mxu1 %v2379_v58 }
 0x223   :  { %1558 = vmatprep.mubr.bf16.mxu1 %v1075_v36  ;;  %1988 = vmatprep.subr.bf16.mxu0 %v2226_v33 }
 0x224   :  { %1559 = vmatmul.mubr.bf16.gmra.mxu1 %v1074_v38 }
 0x225   :  { %2032 = vmatpush3.bf16.msra.mxu1 %v2236_v9  ;;  %2043 = vmatprep.mubr.msk.bf16.mxu1 %vm2381_vm6, %v2379_v58 }
 0x226   :  { %1989 = vmatpush3.bf16.msra.mxu0 %v2227_v39  ;;  %2033 = vmatprep.subr.bf16.mxu1 %v2379_v58 }
 0x227   :  { %1990 = vmatprep.subr.bf16.mxu0 %v2228_v40 }
 0x229   :  { %2034 = vmatpush3.bf16.msra.mxu1 %v2237_v51 }
 0x22a   :  { %1991 = vmatpush3.bf16.msra.mxu0 %v2229_v41  ;;  %2035 = vmatprep.subr.bf16.mxu1 %v2379_v58 }
 0x22b   :  { %1992 = vmatprep.subr.bf16.mxu0 %v2230_v42 }
 0x22d   :  { %2036 = vmatpush3.bf16.msra.mxu1 %v2238_v10 }
 0x22e   :  { %1993 = vmatpush3.bf16.msra.mxu0 %v2231_v44  ;;  %2037 = vmatprep.subr.bf16.mxu1 %v2379_v58 }
 0x22f   :  { %1994 = vmatprep.subr.bf16.mxu0 %v2232_v46 }
 0x231   :  { %2038 = vmatpush3.bf16.msra.mxu1 %v2239_v11 }
 0x232   :  { %1995 = vmatpush3.bf16.msra.mxu0 %v2233_v53  ;;  %2039 = vmatprep.subr.bf16.mxu1 %v2379_v58 }
 0x235   :  { %1600 = vmatmul.mubr.bf16.vlgmr.msra.gmra.mxu0 %v1070_v63  ;;  %2040 = vmatpush3.bf16.msra.mxu1 %v2240_v12 }
 0x236   :  { %1607 = vmatprep.mubr.bf16.mxu0 %v1077_v26  ;;  %2041 = vmatprep.subr.bf16.mxu1 %v2379_v58 }
 0x239   :  { %2042 = vmatpush3.bf16.msra.mxu1 %v2241_v13 }
 0x23d   :  { %1608 = vmatmul.mubr.bf16.gmra.mxu0 %v1076_v6 }
 0x2d5   :  { %v1940_v14 = vpop.f32.mrf.mxu0 }
 0x2d7   :  { %v1941_v15 = vpop.f32.mrf.mxu0 }
 0x2d8   :  { %v1942_v28 = vadd.f32 %v1941_v15, %v1940_v14 }
 0x2d9   :  { %v1943_v16 = vpop.f32.mrf.mxu0 }
 0x2da   :  { %v1504_v34 = vadd.f32 %v1942_v28, %v1861_v29 }
 0x2db   :  { %v1944_v18 = vpop.f32.mrf.mxu0 }
 0x2dc   :  { %v1968_v17 = vpop.f32.mrf.mxu1  ;;  %v1945_v32 = vadd.f32 %v1944_v18, %v1943_v16 }
 0x2dd   :  { %v1946_v20 = vpop.f32.mrf.mxu0 }
 0x2de   :  { %v1969_v19 = vpop.f32.mrf.mxu1  ;;  %v1507_v40 = vadd.f32 %v1945_v32, %v1861_v29 }
 0x2df   :  { %v1947_v22 = vpop.f32.mrf.mxu0  ;;  %v1970_v31 = vadd.f32 %v1969_v19, %v1968_v17 }
 0x2e0   :  { %v1971_v21 = vpop.f32.mrf.mxu1  ;;  %v1948_v41 = vadd.f32 %v1947_v22, %v1946_v20 }
 0x2e1   :  { %v1949_v24 = vpop.f32.mrf.mxu0  ;;  %v1553_v39 = vadd.f32 %v1970_v31, %v1504_v34 }
 0x2e2   :  { %v1972_v23 = vpop.f32.mrf.mxu1  ;;  %v1512_v52 = vadd.f32 %v1948_v41, %v1861_v29 }
 0x2e3   :  { %v1950_v27 = vpop.f32.mrf.mxu0  ;;  %v1973_v35 = vadd.f32 %v1972_v23, %v1971_v21  ;;  %v1910_v23 = vld [vmem:[%s2544_s8] ss:$0 sm:$0xff] }
 0x2e4   :  { %v1974_v25 = vpop.f32.mrf.mxu1  ;;  %v1951_v49 = vadd.f32 %v1950_v27, %v1949_v24 }
 0x2e5   :  { %v1556_v43 = vadd.f32 %v1973_v35, %v1507_v40 }
 0x2e6   :  { %v1975_v58 = vpop.f32.mrf.mxu1  ;;  %v1515_v62 = vadd.f32 %v1951_v49, %v1861_v29 }
 0x2e7   :  { %v1976_v48 = vadd.f32 %v1975_v58, %v1974_v25 }
 0x2e8   :  { %v1977_v37 = vpop.f32.mrf.mxu1 }
 0x2e9   :  { %v1561_v60 = vadd.f32 %v1976_v48, %v1512_v52 }
 0x2ea   :  { %v1978_v46 = vpop.f32.mrf.mxu1 }
 0x2eb   :  { %v1979_v54 = vadd.f32 %v1978_v46, %v1977_v37 }
 0x2ed   :  { %v1564_v1 = vadd.f32 %v1979_v54, %v1515_v62 }
 0x2f5   :  { %v1996_v30 = vpop.f32.mrf.mxu0 }
 0x2f7   :  { %v1997_v33 = vpop.f32.mrf.mxu0 }
 0x2f8   :  { %v1998_v36 = vadd.f32 %v1997_v33, %v1996_v30 }
 0x2f9   :  { %v1999_v38 = vpop.f32.mrf.mxu0 }
 0x2fa   :  { %v1602_v44 = vadd.f32 %v1998_v36, %v1553_v39 }
 0x2fb   :  { %v2000_v42 = vpop.f32.mrf.mxu0 }
 0x2fc   :  { %v2001_v45 = vadd.f32 %v2000_v42, %v1999_v38  ;;  %v1616_v55 = vmax.f32 %v1602_v44, 0.0 }
 0x2fd   :  { %v2002_v47 = vpop.f32.mrf.mxu0 }
 0x2fe   :  { %v1605_v50 = vadd.f32 %v2001_v45, %v1556_v43 }
 0x2ff   :  { %v2003_v53 = vpop.f32.mrf.mxu0 }
 0x300   :  { %v1617_v56 = vmax.f32 %v1605_v50, 0.0  ;;  %v2004_v57 = vadd.f32 %v2003_v53, %v2002_v47 }
 0x301   :  { %v2005_v59 = vpop.f32.mrf.mxu0 }
 0x302   :  { %v1620_v63 = vadd.f32 %v1617_v56, %v1616_v55  ;;  %v1610_v2 = vadd.f32 %v2004_v57, %v1561_v60 }
 0x303   :  { %v2006_v0 = vpop.f32.mrf.mxu0 }
 0x304   :  { %v1621_v26 = vrot.slane %v1620_v63, 4  ;;  %v2007_v3 = vadd.f32 %v2006_v0, %v2005_v59  ;;  %v1618_v6 = vmax.f32 %v1610_v2, 0.0 }
 0x306   :  { %v1622_v61 = vadd.f32 %v1621_v26, %v1620_v63  ;;  %v1613_v4 = vadd.f32 %v2007_v3, %v1564_v1 }
 0x308   :  { %v1623_v5 = vrot.slane %v1622_v61, 2  ;;  %v1619_v7 = vmax.f32 %v1613_v4, 0.0 }
 0x30a   :  { %v1624_v8 = vadd.f32 %v1623_v5, %v1622_v61  ;;  %v1627_v9 = vadd.f32 %v1619_v7, %v1618_v6 }
 0x30c   :  { %v1628_v51 = vrot.slane %v1627_v9, 4  ;;  %v1625_v10 = vrot.slane %v1624_v8, 1 }
 0x30e   :  { %v1629_v11 = vadd.f32 %v1628_v51, %v1627_v9  ;;  %v1626_v13 = vadd.f32 %v1625_v10, %v1624_v8 }
 0x310   :  { %v1630_v12 = vrot.slane %v1629_v11, 2  ;;  %v1634_v16 = vpack.c.bf16 %v1626_v13, %v1626_v13 }
 0x312   :  { %v1631_v14 = vadd.f32 %v1630_v12, %v1629_v11  ;;  %v1661_v19 = vunpack.c.l.b16 %v1634_v16 }
 0x314   :  { %v1632_v15 = vrot.slane %v1631_v14, 1 }
 0x316   :  { %v1633_v17 = vadd.f32 %v1632_v15, %v1631_v14 }
 0x318   :  { %v1635_v18 = vpack.c.bf16 %v1633_v17, %v1633_v17 }
 0x31a   :  { %v1662_v20 = vunpack.c.l.b16 %v1635_v18 }
 0x31c   :  { %v1664_v21 = vsel %vm1663_vm7, %v1662_v20, %v1661_v19 }
 0x31d   :  { %v1665_v22 = vpack.c.b16 %v1664_v21, %v1664_v21 }
 0x31f   :  { %2044 = vmatmul.mubr.bf16.vlgmr.msra.gmra.mxu1 %v1665_v22 }
 0x3df   :  { %v1749_v24 = vpop.f32.mrf.mxu1 }
 0x3e0   :  { %v1750_v25 = vadd.f32 %v1910_v23, %v1749_v24 }
 0x3e1   :  { %v2045_v27 = vpop.f32.mrf.mxu1 }
 0x3e2   :  { %1755 = vst [vmem:[#allocation13] sm:$0x3] %v1750_v25 }
 0x3e3   :  { %v1752_v28 = vpop.f32.mrf.mxu1 }
 0x3e4   :  { %2353 = shalt.err (!%p2350_p1)
}
 0x3e5   :  { %1765 = dma.vmem_to_hbm [thread:$0]  %s1763_s18, 32, %s2545_s9, [#allocation6]   ;;  %v2046_v29 = vpop.f32.mrf.mxu1 }
 0x3e6   :  { %2368 = dma.done.wait [#allocation6], 32  }
 0x3e7   :  { %2369 = vsyncadd [#allocation6], 4294967264 }
 0x3e8   :  { %1769 = vsyncpa [#allocation5], 1 }
 0x3e9   :  { %1770 = vsyncpa [#allocation8], 1 }
 0x3ea   :  { %1771 = vsyncpa [#allocation11], 1 }
 0x3eb   :  { %1772 = vsyncpa [#allocation6], 1 }

</bundles_post_ra>
